<compile_context>
chip_gen: v7x
topology: tpu7x:2x2x1
jax: 0.10.0
libtpu: 0.0.40
codegen_flags: <defaults>
</compile_context>

<pallas_src>
import jax
import jax.numpy as jnp
from jax.experimental import pallas as pl
from jax.experimental.pallas import tpu as pltpu

# ---- norse LIF default parameters (LIFParameters()) ----
_DT = 1e-3
_TAU_MEM_INV = 100.0   # 1 / 1e-2
_TAU_SYN_INV = 200.0   # 1 / 5e-3
_V_LEAK = 0.0
_V_TH = 1.0
_V_RESET = 0.0

_VMEM_BUDGET = 40 << 20   # conservative working-set budget (v7x: 64 MiB / TC)
_VMEM_CAP = 48 << 20      # never ask the compiler for more than this


def _round_up(x, m):
    return (x + m - 1) // m * m


def _lif_step_fresh(cur):
    """norse.lif_feed_forward_step with a fresh zero state (v = v_leak = 0, i = 0),
    matching the order of operations exactly (decay -> threshold -> reset ->
    current injection). Returns the spike output z; the new state is discarded
    (as in the module's forward) and is DCE'd by the compiler."""
    v0 = jnp.zeros_like(cur)
    i0 = jnp.zeros_like(cur)
    dv = _DT * _TAU_MEM_INV * ((_V_LEAK - v0) + i0)
    v_decayed = v0 + dv
    di = -_DT * _TAU_SYN_INV * i0
    i_decayed = i0 + di
    # super-spike surrogate forward value: heaviside(v_decayed - v_th)
    z = (v_decayed - _V_TH > 0.0).astype(jnp.float32)
    v_new = (1.0 - z) * v_decayed + z * _V_RESET   # new state, discarded
    i_new = i_decayed + cur                        # new state, discarded
    del v_new, i_new
    return z


# ---------------------------------------------------------------------------
# Kernels
# ---------------------------------------------------------------------------
def _snn_kernel_fused(x_ref, w1t_ref, b1_ref, w2t_ref, b2_ref, o_ref):
    """Primary path: full-K fc1 -> bias -> LIF -> fc2, straight-line.
    x arrives as f32 and is cast to bf16 in-register; accumulation is f32."""
    cur = jnp.dot(x_ref[...].astype(jnp.bfloat16), w1t_ref[...],
                  preferred_element_type=jnp.float32) + b1_ref[...]
    z = _lif_step_fresh(cur)
    # z is exactly {0,1} so the bf16 cast for the fc2 MXU dot is lossless.
    o_ref[...] = (jnp.dot(z.astype(w2t_ref.dtype), w2t_ref[...],
                          preferred_element_type=jnp.float32)
                  + b2_ref[...]).astype(o_ref.dtype)


def _snn_kernel_ktiled(x_ref, w1t_ref, b1_ref, w2t_ref, b2_ref, o_ref, acc_ref):
    """Fallback for very large F: K-tiled fc1 with an f32 VMEM accumulator."""
    k = pl.program_id(1)

    @pl.when(k == 0)
    def _():
        acc_ref[...] = jnp.zeros_like(acc_ref)

    acc_ref[...] += jnp.dot(x_ref[...], w1t_ref[...],
                            preferred_element_type=jnp.float32)

    @pl.when(k == pl.num_programs(1) - 1)
    def _():
        cur = acc_ref[...] + b1_ref[...]
        z = _lif_step_fresh(cur)
        o_ref[...] = (jnp.dot(z.astype(w2t_ref.dtype), w2t_ref[...],
                              preferred_element_type=jnp.float32)
                      + b2_ref[...]).astype(o_ref.dtype)


# ---------------------------------------------------------------------------
# One-time parameter preparation (hoisted out of the forward path)
# ---------------------------------------------------------------------------
def prepare_snn_params(w1, b1, w2, b2):
    """Transpose weights to [in, out], pad out-features to full 128 lanes
    (lane-dense stores / dots, no masked vst), cast weights to bf16 (f32
    accumulation happens on the MXU), biases stay f32."""
    w1 = jnp.asarray(w1, jnp.float32)
    b1 = jnp.asarray(b1, jnp.float32)
    w2 = jnp.asarray(w2, jnp.float32)
    b2 = jnp.asarray(b2, jnp.float32)
    H, F = w1.shape
    C = w2.shape[0]
    Hp = _round_up(H, 128)
    Cp = _round_up(C, 128)
    w1t = jnp.zeros((F, Hp), jnp.bfloat16).at[:, :H].set(w1.T.astype(jnp.bfloat16))
    b1p = jnp.zeros((1, Hp), jnp.float32).at[0, :H].set(b1)
    w2t = jnp.zeros((Hp, Cp), jnp.bfloat16).at[:H, :C].set(w2.T.astype(jnp.bfloat16))
    b2p = jnp.zeros((1, Cp), jnp.float32).at[0, :C].set(b2)
    return dict(w1t=w1t, b1=b1p, w2t=w2t, b2=b2p, F=F, H=H, C=C, Hp=Hp, Cp=Cp)


# ---------------------------------------------------------------------------
# Tiling heuristics
# ---------------------------------------------------------------------------
def _fused_vmem_bytes(bm, F, Hp, Cp):
    return (2 * bm * F * 4        # x tile, f32, double-buffered
            + F * Hp * 2          # w1t, bf16, single-buffered (grid-invariant)
            + Hp * 4              # b1, f32
            + Hp * Cp * 2         # w2t, bf16
            + Cp * 4              # b2, f32
            + 2 * bm * Cp * 4)    # out tile, f32, double-buffered


def _pick_bm(B):
    """Largest batch tile <=512 that divides B, is a multiple of 8, and leaves
    at least two blocks on the 'parallel' grid axis (v7x megacore). Small /
    odd B falls back to a single full-extent block."""
    if B % 8 == 0 and B >= 16:
        for c in (512, 256, 128, 64, 32, 16, 8):
            if B % c == 0 and B // c >= 2:
                return c
    return B


# ---------------------------------------------------------------------------
# Forward
# ---------------------------------------------------------------------------
def snn_forward(x, params, *, tk=2048):
    """fc2(LIF(fc1(x))). x: [B, F] float32, params from prepare_snn_params."""
    x = jnp.asarray(x, jnp.float32)
    B, F = x.shape
    assert F == params["F"], "feature dim mismatch with prepared params"
    Hp, Cp, C = params["Hp"], params["Cp"], params["C"]
    w1t, b1p, w2t, b2p = params["w1t"], params["b1"], params["w2t"], params["b2"]

    bm = _pick_bm(B)

    # Shrink bm if the full-F x tile would blow the VMEM budget (keeps bm a
    # multiple of 8 and a divisor of B).
    bm_fused = bm
    while bm_fused % 16 == 0 and _fused_vmem_bytes(bm_fused, F, Hp, Cp) > _VMEM_BUDGET:
        bm_fused //= 2

    if _fused_vmem_bytes(bm_fused, F, Hp, Cp) <= _VMEM_BUDGET:
        # ---- primary path: no K axis, no accumulator, x streamed untouched ----
        nb = B // bm_fused
        vmem_est = _fused_vmem_bytes(bm_fused, F, Hp, Cp)
        vmem_limit = int(min(max(2 * vmem_est, 4 << 20), _VMEM_CAP))
        out = pl.pallas_call(
            _snn_kernel_fused,
            out_shape=jax.ShapeDtypeStruct((B, Cp), jnp.float32),
            grid_spec=pltpu.PrefetchScalarGridSpec(
                num_scalar_prefetch=0,
                grid=(nb,),
                in_specs=[
                    # x batch tile streams over the parallel axis
                    pl.BlockSpec((bm_fused, F), lambda i: (i, 0)),
                    # grid-invariant operands: single-buffered, stay resident
                    pl.BlockSpec((F, Hp), lambda i: (0, 0),
                                 pipeline_mode=pl.Buffered(1)),
                    pl.BlockSpec((1, Hp), lambda i: (0, 0),
                                 pipeline_mode=pl.Buffered(1)),
                    pl.BlockSpec((Hp, Cp), lambda i: (0, 0),
                                 pipeline_mode=pl.Buffered(1)),
                    pl.BlockSpec((1, Cp), lambda i: (0, 0),
                                 pipeline_mode=pl.Buffered(1)),
                ],
                out_specs=pl.BlockSpec((bm_fused, Cp), lambda i: (i, 0)),
            ),
            compiler_params=pltpu.CompilerParams(
                dimension_semantics=("parallel",),
                vmem_limit_bytes=vmem_limit),
        )(x, w1t, b1p, w2t, b2p)
        return out[:, :C]

    # ---- fallback: F too large for a resident full-K tile -> K-tiled path ----
    tk = max(128, min(tk, _round_up(F, 128)))
    Fp = _round_up(F, tk)
    xp = jnp.zeros((B, Fp), jnp.bfloat16).at[:, :F].set(x.astype(jnp.bfloat16))
    vmem_est = (2 * bm * tk * 2 + 2 * tk * Hp * 2 + Hp * 4 + Hp * Cp * 2
                + Cp * 4 + 2 * bm * Cp * 4 + bm * Hp * 4)
    vmem_limit = int(min(max(2 * vmem_est, 4 << 20), _VMEM_CAP))
    out = pl.pallas_call(
        _snn_kernel_ktiled,
        out_shape=jax.ShapeDtypeStruct((B, Cp), jnp.float32),
        grid_spec=pltpu.PrefetchScalarGridSpec(
            num_scalar_prefetch=0,
            grid=(B // bm, Fp // tk),
            in_specs=[
                pl.BlockSpec((bm, tk), lambda i, k: (i, k)),
                pl.BlockSpec((tk, Hp), lambda i, k: (k, 0)),
                pl.BlockSpec((1, Hp), lambda i, k: (0, 0),
                             pipeline_mode=pl.Buffered(1)),
                pl.BlockSpec((Hp, Cp), lambda i, k: (0, 0),
                             pipeline_mode=pl.Buffered(1)),
                pl.BlockSpec((1, Cp), lambda i, k: (0, 0),
                             pipeline_mode=pl.Buffered(1)),
            ],
            out_specs=pl.BlockSpec((bm, Cp), lambda i, k: (i, 0)),
            scratch_shapes=[pltpu.VMEM((bm, Hp), jnp.float32)],
        ),
        compiler_params=pltpu.CompilerParams(
            dimension_semantics=("parallel", "arbitrary"),
            vmem_limit_bytes=vmem_limit),
    )(xp, w1t, b1p, w2t, b2p)
    return out[:, :C]


def _init_linear(key, out_f, in_f):
    """Deterministic PyTorch-style Linear init: U(-1/sqrt(in), 1/sqrt(in))."""
    kw, kb = jax.random.split(key)
    bound = 1.0 / jnp.sqrt(jnp.float32(in_f))
    w = jax.random.uniform(kw, (out_f, in_f), jnp.float32, -bound, bound)
    b = jax.random.uniform(kb, (out_f,), jnp.float32, -bound, bound)
    return w, b


if __name__ == "__main__":
    key = jax.random.PRNGKey(0)
    k_x, k_fc1, k_fc2 = jax.random.split(key, 3)

    B = 256                # batch: 2 parallel blocks at bm=128 (megacore-friendly)
    F = 512                # input_features (stands in for flattened NORB)
    H = 100                # hidden size fixed by the module
    C = 5                  # num_classes (NORB has 5)

    x = jax.random.normal(k_x, (B, F), jnp.float32)
    w1, b1 = _init_linear(k_fc1, H, F)
    w2, b2 = _init_linear(k_fc2, C, H)

    params = prepare_snn_params(w1, b1, w2, b2)   # one-time prep, hoisted
    out = snn_forward(x, params)
    out = jax.block_until_ready(out)

    # Reference semantics: with a fresh LIF state and a single Euler step the
    # spike output is all zeros, so fc2's bias is broadcast over the batch.
    ref = jnp.broadcast_to(b2[None, :], (B, C))
    assert out.shape == (B, C)
    assert jnp.allclose(out, ref, atol=1e-6), "mismatch vs. reference semantics"

    # TODO(synk): the module's forward never carries LIF state across calls; a
    # multi-timestep variant should loop timesteps inside the kernel with (v, i)
    # held in VMEM scratch so the resident fc1/fc2 weights are DMA'd once per
    # batch tile instead of once per step.
    print("KERNEL_OK")
</pallas_src>

<mosaic_0001>
module attributes {stable_mosaic.version = 11 : i64} {
  func.func @_snn_kernel_fused(%arg0: i32, %arg1: memref<128x512xf32, #tpu.memory_space<vmem>>, %arg2: memref<512x128xbf16, #tpu.memory_space<vmem>>, %arg3: memref<1x128xf32, #tpu.memory_space<vmem>>, %arg4: memref<128x128xbf16, #tpu.memory_space<vmem>>, %arg5: memref<1x128xf32, #tpu.memory_space<vmem>>, %arg6: memref<128x128xf32, #tpu.memory_space<vmem>>) attributes {dimension_semantics = [#tpu.dimension_semantics<parallel>], iteration_bounds = array<i64: 2>, scalar_prefetch = 0 : i64, scratch_operands = 0 : i64, tpu.core_type = #tpu.core_type<tc>, window_params = [{transform_indices = @transform_0, window_bounds = array<i64: 128, 512>}, {pipeline_mode = #tpu.pipeline_mode<synchronous>, transform_indices = @transform_1, window_bounds = array<i64: 512, 128>}, {pipeline_mode = #tpu.pipeline_mode<synchronous>, transform_indices = @transform_2, window_bounds = array<i64: 1, 128>}, {pipeline_mode = #tpu.pipeline_mode<synchronous>, transform_indices = @transform_3, window_bounds = array<i64: 128, 128>}, {pipeline_mode = #tpu.pipeline_mode<synchronous>, transform_indices = @transform_4, window_bounds = array<i64: 1, 128>}, {transform_indices = @transform_5, window_bounds = array<i64: 128, 128>}]} {
    %cst = arith.constant 0.000000e+00 : f32
    %0 = vector.broadcast %cst : f32 to vector<128x128xf32>
    %cst_0 = arith.constant 0.000000e+00 : f32
    %1 = vector.broadcast %cst_0 : f32 to vector<128x128xf32>
    %cst_1 = arith.constant 0.000000e+00 : f32
    %2 = vector.broadcast %cst_1 : f32 to vector<128x128xf32>
    %3 = arith.subf %2, %0 : vector<128x128xf32>
    %4 = arith.addf %3, %1 : vector<128x128xf32>
    %cst_2 = arith.constant 1.000000e-01 : f32
    %5 = vector.broadcast %cst_2 : f32 to vector<128x128xf32>
    %6 = arith.mulf %5, %4 : vector<128x128xf32>
    %7 = arith.addf %0, %6 : vector<128x128xf32>
    %cst_3 = arith.constant 1.000000e+00 : f32
    %8 = vector.broadcast %cst_3 : f32 to vector<128x128xf32>
    %9 = arith.subf %7, %8 : vector<128x128xf32>
    %cst_4 = arith.constant 0.000000e+00 : f32
    %10 = vector.broadcast %cst_4 : f32 to vector<128x128xf32>
    %11 = arith.cmpf ogt, %9, %10 : vector<128x128xf32>
    %12 = arith.extui %11 : vector<128x128xi1> to vector<128x128xi32>
    %13 = arith.sitofp %12 : vector<128x128xi32> to vector<128x128xf32>
    %14 = arith.truncf %13 : vector<128x128xf32> to vector<128x128xbf16>
    %c0 = arith.constant 0 : index
    %c0_5 = arith.constant 0 : index
    %15 = vector.load %arg4[%c0, %c0_5] : memref<128x128xbf16, #tpu.memory_space<vmem>>, vector<128x128xbf16>
    %cst_6 = arith.constant dense<0.000000e+00> : vector<128x128xf32>
    %16 = tpu.matmul %14, %15, %cst_6 {dimension_numbers = #tpu.dot_dimension_numbers<[1], [0], [0], [1], [0, 0, 1, 1], [], []>} : vector<128x128xbf16>, vector<128x128xbf16>, vector<128x128xf32> -> vector<128x128xf32>
    %c0_7 = arith.constant 0 : index
    %c0_8 = arith.constant 0 : index
    %17 = vector.load %arg5[%c0_7, %c0_8] : memref<1x128xf32, #tpu.memory_space<vmem>>, vector<1x128xf32>
    %18 = vector.broadcast %17 : vector<1x128xf32> to vector<128x128xf32>
    %19 = arith.addf %16, %18 : vector<128x128xf32>
    %c0_9 = arith.constant 0 : index
    %c0_10 = arith.constant 0 : index
    %20 = vector.load %arg6[%c0_9, %c0_10] : memref<128x128xf32, #tpu.memory_space<vmem>>, vector<128x128xf32>
    tpu.vector_store %arg6[%c0_9, %c0_10], %19 {strides = array<i32>} : memref<128x128xf32, #tpu.memory_space<vmem>>, vector<128x128xf32>,
    return
  }
  func.func @transform_0(%arg0: i32) -> (i32, i32) {
    %c0_i32 = arith.constant 0 : i32
    %c0_i32_0 = arith.constant 0 : i32
    return %arg0, %c0_i32 : i32, i32
  }
  func.func @transform_1(%arg0: i32) -> (i32, i32) {
    %c0_i32 = arith.constant 0 : i32
    %c0_i32_0 = arith.constant 0 : i32
    %c0_i32_1 = arith.constant 0 : i32
    return %c0_i32, %c0_i32_0 : i32, i32
  }
  func.func @transform_2(%arg0: i32) -> (i32, i32) {
    %c0_i32 = arith.constant 0 : i32
    %c0_i32_0 = arith.constant 0 : i32
    %c0_i32_1 = arith.constant 0 : i32
    return %c0_i32, %c0_i32_0 : i32, i32
  }
  func.func @transform_3(%arg0: i32) -> (i32, i32) {
    %c0_i32 = arith.constant 0 : i32
    %c0_i32_0 = arith.constant 0 : i32
    %c0_i32_1 = arith.constant 0 : i32
    return %c0_i32, %c0_i32_0 : i32, i32
  }
  func.func @transform_4(%arg0: i32) -> (i32, i32) {
    %c0_i32 = arith.constant 0 : i32
    %c0_i32_0 = arith.constant 0 : i32
    %c0_i32_1 = arith.constant 0 : i32
    return %c0_i32, %c0_i32_0 : i32, i32
  }
  func.func @transform_5(%arg0: i32) -> (i32, i32) {
    %c0_i32 = arith.constant 0 : i32
    %c0_i32_0 = arith.constant 0 : i32
    return %arg0, %c0_i32 : i32, i32
  }
}

</mosaic_0001>

<bundles_post_ra>
// kernel: tpu_custom_call.1
= control target key start
LH: loop header
LB: loop body
LE: loop exit
PB: predicated region body
PF: predicated region fallthrough
CT: control target
= control target key end

     0   :  { %10 = vsyncpa [#allocation3], 0  ;;  %s1201_s0 = inlined_call_operand.hbm [shape: f32[256,512], index: 0, kind: input, shape index: {}]   ;;  %s1202_s1 = inlined_call_operand.hbm [shape: bf16[512,128], index: 1, kind: input, shape index: {}]   ;;  %s1203_s2 = inlined_call_operand.vmem [shape: f32[1,128], index: 2, kind: input, shape index: {}]   ;;  %s1204_s3 = inlined_call_operand.hbm [shape: bf16[128,128], index: 3, kind: input, shape index: {}]   ;;  %s1205_s4 = inlined_call_operand.vmem [shape: f32[1,128], index: 4, kind: input, shape index: {}]   ;;  %s1206_s5 = inlined_call_operand.hbm [shape: f32[256,128], index: 5, kind: output, shape index: {}]  }
   0x1   :  { %12 = vsyncpa [#allocation3 + $0x1], 0 }
   0x2   :  { %13 = vsyncpa [#allocation6], 0 }
   0x3   :  { %14 = vsyncpa [#allocation4], 0 }
   0x4   :  { %16 = vsyncpa [#allocation4 + $0x1], 0  ;;  %s945_s18 = smov 0   ;;  %s947_s19 = smov 0  }
   0x5   :  { %s949_s20 = smov 0   ;;  %s951_s2 = smov 0  }
   0x6 LB: > { %s966_s21 = sadd.s32 4294967295, %s902_s2   ;;  %s570_s22 = sadd.s32 4294967294, %s902_s2   ;;  %s902_s2 = sphi %s951_s2, %s1226_s2   ;;  %s898_s20 = sphi %s949_s20, %s1225_s20   ;;  %s894_s19 = sphi %s947_s19, %s1224_s19   ;;  %s890_s18 = sphi %s945_s18, %s1223_s18  }
   0x7   : > { %p42_p0 = scmp.ne.s32.totalorder %s894_s19, %s890_s18  ;;  %p1207_p1 = scmp.eq.s32.totalorder %s966_s21, 0 }
   0x8   : > { %p156_p3 = scmp.eq.s32.totalorder %s570_s22, 1  ;;  %p571_p5 = scmp.ge.s32.totalorder %s902_s2, 1 }
   0x9   : > { %p975_p4 = por %p1207_p1, %p42_p0  ;;  %p163_p7 = scmp.lt.s32.totalorder %s902_s2, 3 }
   0xa   : > { %p980_p6 = por %p156_p3, %p42_p0  ;;  %s904_s26 = smov [#allocation5]  }
   0xb   : > { %s1210_s23 = scalar_select %p975_p4, 1, 0 }
   0xc   : > { %s1211_s24 = scalar_select %p980_p6, 1, 0 }
   0xd   : > { %p985_p8 = pnand %p571_p5, %p163_p7  ;;  %s175_s27 = sshll.u32 %s904_s26, 4  ;;  %s989_s27 = int_to_ptr.vmem [resolvable:$true] %s175_s27 }
   0xe   : > { %s905_s29 = smov [#allocation7]   ;;  %s746_s8 = scalar_lea.hbm %s1202_s1, 4096 }
   0xf   : > { %p676_p9 = pneg %p985_p8  ;;  %s191_s30 = sshll.u32 %s905_s29, 4  ;;  %s1000_s30 = int_to_ptr.vmem [resolvable:$true] %s191_s30 }
  0x10   : > { %p747_p12 = scmp.ne.s32.totalorder %s1202_s1, %s746_s8  ;;  %p753_p5 = scmp.lt.u32.totalorder %s746_s8, %s1202_s1 }
  0x11   : > { %p996_p11 = pnand %p676_p9, %p1207_p1 }
  0x13   : > { %p748_p13 = pneg %p996_p11 }
  0x15   : > { %p749_p0 = pnand %p748_p13, %p747_p12 }
  0x17   : > { %p750_p3 = pneg %p749_p0 }
  0x19   : > { %p755_p7 = pnand %p753_p5, %p750_p3 }
  0x1b   : > { %758 = shalt.err (!%p755_p7)
}
  0x1c   : > { %s759_s13 = scalar_lea.vmem %s989_s27, 4096  ;;  %p767_p2 = scmp.lt.s32.totalorder %s989_s27, %s989_s27 }
  0x1d   : > { %p760_p9 = scmp.ne.s32.totalorder %s989_s27, %s759_s13  ;;  %p768_p12 = scmp.lt.s32.totalorder %s759_s13, %s759_s13 }
  0x1f   : > { %p762_p10 = pnand %p760_p9, %p748_p13  ;;  %p769_p0 = por %p768_p12, %p767_p2 }
  0x21   : > { %p763_p1 = pneg %p762_p10 }
  0x23   : > { %p770_p6 = pnand %p769_p0, %p763_p1 }
  0x25   : > { %773 = shalt.err (!%p770_p6)
}
  0x26   : > { %s906_s14 = smov 64   ;;  %s907_s15 = smov 4  }
  0x27   : > { %679 = dma.hbm_to_vmem [thread:$0]  (!%p996_p11), %s1202_s1, 4096, %s989_s27, [#allocation6], %s906_s14, %s906_s14, %s907_s15  }
  0x28   : > { %s774_s29 = scalar_lea.hbm %s1204_s3, 1024 }
  0x29   : > { %p775_p2 = scmp.ne.s32.totalorder %s1204_s3, %s774_s29  ;;  %p781_p10 = scmp.lt.u32.totalorder %s774_s29, %s1204_s3 }
  0x2b   : > { %p777_p1 = pnand %p775_p2, %p748_p13 }
  0x2d   : > { %p778_p6 = pneg %p777_p1 }
  0x2f   : > { %p783_p3 = pnand %p781_p10, %p778_p6 }
  0x31   : > { %786 = shalt.err (!%p783_p3)
}
  0x32   : > { %s787_s27 = scalar_lea.vmem %s1000_s30, 1024  ;;  %p795_p12 = scmp.lt.s32.totalorder %s1000_s30, %s1000_s30 }
  0x33   : > { %p788_p5 = scmp.ne.s32.totalorder %s1000_s30, %s787_s27  ;;  %p796_p0 = scmp.lt.s32.totalorder %s787_s27, %s787_s27 }
  0x35   : > { %p790_p7 = pnand %p788_p5, %p748_p13  ;;  %p797_p2 = por %p796_p0, %p795_p12 }
  0x37   : > { %p791_p9 = pneg %p790_p7 }
  0x39   : > { %p798_p1 = pnand %p797_p2, %p791_p9 }
  0x3b   : > { %801 = shalt.err (!%p798_p1)
}
  0x3c   : > { %682 = dma.hbm_to_vmem [thread:$0]  (!%p996_p11), %s1204_s3, 1024, %s1000_s30, [#allocation6], %s906_s14, %s906_s14, %s907_s15  }
  0x3d   : > { %s1055_s12 = sadd.s32 1, %s902_s2   ;;  %s29_s28 = sadd.s32 1, %s898_s20 }
  0x3e   : > { %s26_s13 = ssub.s32 %s902_s2, %s1055_s12  ;;  %p36_p13 = scmp.ne.s32.totalorder %s898_s20, %s894_s19 }
  0x3f   : > { %p27_p6 = scmp.eq.s32.totalorder %s26_s13, 0  ;;  %p37_p10 = scmp.eq.s32.totalorder %s902_s2, 0 }
  0x40   : > { %p1214_p3 = scmp.eq.s32.totalorder %s966_s21, 1  ;;  %p693_p7 = scmp.lt.s32.totalorder %s902_s2, 2 }
  0x41   : > { %s1071_s17 = scalar_select %p27_p6, %s898_s20, %s29_s28  }
  0x42   : > { %p1065_p5 = por %p1214_p3, %p36_p13  ;;  %p38_p9 = por %p37_p10, %p36_p13 }
  0x43   : > { %s208_s22 = sand.u32 1, %s898_s20   ;;  %s598_s30 = sshll.u32 %s902_s2, 13 }
  0x44   : > { %s1215_s16 = scalar_select %p1065_p5, 1, 0 }
  0x45   : > { %s575_s26 = sshll.u32 %s208_s22, 9  ;;  %s1078_s29 = scalar_lea.hbm %s1201_s0, %s598_s30 }
  0x46   : > { %s212_s6 = scalar_lea.vmem [#allocation2], %s575_s26  ;;  %p1082_p11 = pnand %p693_p7, %p38_p9 }
  0x47   : > { %s220_s7 = sshll.u32 %s212_s6, 4  ;;  %s1086_s9 = scalar_lea.sflag [#allocation3], %s208_s22  ;;  %s1080_s7 = int_to_ptr.vmem [resolvable:$true] %s220_s7 }
  0x48   : > { %s802_s27 = scalar_lea.hbm %s1078_s29, 8192  ;;  %p804_p0 = pneg %p1082_p11 }
  0x49   : > { %p803_p12 = scmp.ne.s32.totalorder %s1078_s29, %s802_s27  ;;  %s807_s28 = scalar_lea.hbm %s1201_s0, 16384 }
  0x4a   : > { %p808_p13 = scmp.lt.u32.totalorder %s1078_s29, %s1201_s0  ;;  %p809_p6 = scmp.lt.u32.totalorder %s807_s28, %s802_s27 }
  0x4b   : > { %p805_p2 = pnand %p804_p0, %p803_p12  ;;  %p811_p3 = scmp.lt.u32.totalorder %s802_s27, %s1078_s29 }
  0x4c   : > { %p810_p10 = por %p809_p6, %p808_p13 }
  0x4d   : > { %p806_p1 = pneg %p805_p2 }
  0x4e   : > { %p812_p7 = por %p811_p3, %p810_p10 }
  0x50   : > { %p813_p9 = pnand %p812_p7, %p806_p1 }
  0x52   : > { %816 = shalt.err (!%p813_p9)
}
  0x53   : > { %s817_s22 = scalar_lea.vmem %s1080_s7, 8192  ;;  %s908_s30 = smov [#allocation2]  }
  0x54   : > { %p818_p12 = scmp.ne.s32.totalorder %s1080_s7, %s817_s22  ;;  %s822_s14 = sshll.u32 %s908_s30, 4  ;;  %s823_s14 = int_to_ptr.vmem [resolvable:$false] %s822_s14 }
  0x55   : > { %s824_s15 = scalar_lea.vmem %s823_s14, 16384  ;;  %p825_p4 = scmp.lt.s32.totalorder %s1080_s7, %s823_s14 }
  0x56   : > { %p820_p2 = pnand %p818_p12, %p804_p0  ;;  %p826_p13 = scmp.lt.s32.totalorder %s824_s15, %s817_s22 }
  0x58   : > { %p821_p5 = pneg %p820_p2  ;;  %p827_p6 = por %p826_p13, %p825_p4 }
  0x5a   : > { %p828_p10 = pnand %p827_p6, %p821_p5 }
  0x5c   : > { %831 = shalt.err (!%p828_p10)
}
  0x5d   : > { %s909_s6 = smov 512   ;;  %s910_s27 = smov 32  }
  0x5e   : > { %686 = dma.hbm_to_vmem [thread:$0]  (!%p1082_p11), %s1078_s29, 8192, %s1080_s7, %s1086_s9, %s909_s6, %s909_s6, %s910_s27  }
  0x5f   : > { %232 = sbr.rel (%p985_p8) target bundleno = 380 (0x17c), region = 40  ;;  %s1117_s10 = sand.u32 (!%p985_p8), 1, %s894_s19  }
  0x60   : > { %s235_s11 = scalar_lea.sflag (!%p985_p8), [#allocation3], %s1117_s10  ;;  %p1217_p4 = scmp.ne.s32.totalorder (!%p985_p8), %s1210_s23, 0 }
  0x66   : > { %877 = dma.done.wait (%p1217_p4), %s235_s11, 8192  }
  0x67   : > { %879 = vsyncadd (%p1217_p4), %s235_s11, 4294959104  ;;  %p1218_p5 = scmp.eq.s32.totalorder %s966_s21, 0 }
  0x69   : > { %881 = dma.done.wait (%p1218_p5), [#allocation6], 5120   ;;  %p1219_p0 = pmov %p1218_p5 }
  0x6a   : > { %v911_v0 = vmov 0.0|0.0   ;;  %v738_v1 = vld [vmem:[#allocation7] sm:$0xff]   ;;  %v739_v2 = vld [vmem:[#allocation7 + $0x8] sm:$0xff]   ;;  %v740_v3 = vld [vmem:[#allocation7 + $0x10] sm:$0xff]   ;;  %s582_s23 = sshll.u32 %s1117_s10, 7  ;;  %s599_s8 = sshll.u32 %s966_s21, 11 }
  0x6b   : > { %883 = vsyncadd (%p1219_p0), [#allocation6], 4294962176  ;;  %632 = vmatprep.mubr.bf16.mxu0 %v911_v0  ;;  %640 = vmatprep.mubr.bf16.mxu1 %v911_v0  ;;  %v741_v4 = vld [vmem:[#allocation7 + $0x18] sm:$0xff]   ;;  %v742_v5 = vld [vmem:[#allocation7 + $0x20] sm:$0xff]   ;;  %s1132_s7 = scalar_lea.vmem [#allocation8], %s582_s23  ;;  %s1149_s13 = scalar_lea.hbm %s1206_s5, %s599_s8 }
  0x6c   : > { %616 = vmatprep.subr.bf16.mxu0 %v738_v1  ;;  %648 = vmatprep.subr.bf16.mxu1 %v738_v1  ;;  %v743_v6 = vld [vmem:[#allocation7 + $0x28] sm:$0xff]   ;;  %v744_v7 = vld [vmem:[#allocation7 + $0x30] sm:$0xff]   ;;  %v745_v8 = vld [vmem:[#allocation7 + $0x38] sm:$0xff]   ;;  %s478_s9 = sshll.u32 %s1132_s7, 4  ;;  %s465_s26 = scalar_lea.sflag [#allocation4], %s1117_s10  ;;  %s1151_s9 = int_to_ptr.vmem [resolvable:$true] %s478_s9 }
  0x6d   : > { %617 = vmatpush3.bf16.msra.mxu0 %v738_v1  ;;  %656 = vmatpush3.bf16.msra.mxu1 %v738_v1  ;;  %v583_v9 = vld [vmem:[%s1205_s4] ss:$0 sm:$0xff]  ;;  %s832_s22 = scalar_lea.vmem %s1151_s9, 2048  ;;  %p1220_p11 = scmp.ne.s32.totalorder %s1215_s16, 0 }
  0x6e   : > { %618 = vmatprep.subr.bf16.mxu0 %v739_v2  ;;  %649 = vmatprep.subr.bf16.mxu1 %v739_v2  ;;  %p833_p8 = scmp.ne.s32.totalorder %s1151_s9, %s832_s22  ;;  %s912_s30 = smov [#allocation8]  }
  0x6f   : > { %s836_s14 = sshll.u32 %s912_s30, 4  ;;  %s837_s14 = int_to_ptr.vmem [resolvable:$false] %s836_s14 }
  0x70   : > { %p834_p1 = pnand %p833_p8, %p1220_p11  ;;  %s838_s15 = scalar_lea.vmem %s837_s14, 4096 }
  0x71   : > { %619 = vmatpush3.bf16.msra.mxu0 %v739_v2  ;;  %657 = vmatpush3.bf16.msra.mxu1 %v739_v2  ;;  %p839_p7 = scmp.lt.s32.totalorder %s1151_s9, %s837_s14  ;;  %p840_p9 = scmp.lt.s32.totalorder %s838_s15, %s832_s22 }
  0x72   : > { %620 = vmatprep.subr.bf16.mxu0 %v740_v3  ;;  %650 = vmatprep.subr.bf16.mxu1 %v740_v3  ;;  %p835_p3 = pneg %p834_p1 }
  0x73   : > { %p841_p12 = por %p840_p9, %p839_p7 }
  0x75   : > { %621 = vmatpush3.bf16.msra.mxu0 %v740_v3  ;;  %658 = vmatpush3.bf16.msra.mxu1 %v740_v3  ;;  %p842_p2 = pnand %p841_p12, %p835_p3 }
  0x76   : > { %622 = vmatprep.subr.bf16.mxu0 %v741_v4  ;;  %651 = vmatprep.subr.bf16.mxu1 %v741_v4 }
  0x79   : > { %623 = vmatpush3.bf16.msra.mxu0 %v741_v4  ;;  %659 = vmatpush3.bf16.msra.mxu1 %v741_v4 }
  0x7a   : > { %624 = vmatprep.subr.bf16.mxu0 %v742_v5  ;;  %652 = vmatprep.subr.bf16.mxu1 %v742_v5 }
  0x7d   : > { %625 = vmatpush3.bf16.msra.mxu0 %v742_v5  ;;  %660 = vmatpush3.bf16.msra.mxu1 %v742_v5 }
  0x7e   : > { %626 = vmatprep.subr.bf16.mxu0 %v743_v6  ;;  %653 = vmatprep.subr.bf16.mxu1 %v743_v6 }
  0x81   : > { %627 = vmatpush3.bf16.msra.mxu0 %v743_v6  ;;  %661 = vmatpush3.bf16.msra.mxu1 %v743_v6 }
  0x82   : > { %628 = vmatprep.subr.bf16.mxu0 %v744_v7  ;;  %654 = vmatprep.subr.bf16.mxu1 %v744_v7 }
  0x85   : > { %629 = vmatpush3.bf16.msra.mxu0 %v744_v7  ;;  %662 = vmatpush3.bf16.msra.mxu1 %v744_v7 }
  0x86   : > { %630 = vmatprep.subr.bf16.mxu0 %v745_v8  ;;  %655 = vmatprep.subr.bf16.mxu1 %v745_v8 }
  0x89   : > { %631 = vmatpush3.bf16.msra.mxu0 %v745_v8  ;;  %663 = vmatpush3.bf16.msra.mxu1 %v745_v8 }
  0x8c   : > { %633 = vmatmul.mubr.bf16.vlgmr.msra.gmra.mrb[0].mxu0 %v911_v0  ;;  %641 = vmatmul.mubr.bf16.vlgmr.msra.gmra.mrb[0].mxu1 %v911_v0 }
  0x8d   : > { %636 = vmatprep.mubr.bf16.mxu0 %v911_v0  ;;  %644 = vmatprep.mubr.bf16.mxu1 %v911_v0 }
  0x94   : > { %637 = vmatmul.mubr.bf16.gmra.mrb[4].mxu0 %v911_v0  ;;  %645 = vmatmul.mubr.bf16.gmra.mrb[4].mxu1 %v911_v0 }
 0x15f   : > { %v634_v10 = vpop.f32.mrb[0].mxu0  ;;  %v642_v11 = vpop.f32.mrb[0].mxu1 }
 0x160   : > { %v394_v12 = vadd.f32 %v634_v10, %v583_v9  ;;  %v426_v13 = vadd.f32 %v642_v11, %v583_v9  ;;  %v385_v14 = vpop.f32.mrb[1].mxu0  ;;  %v417_v15 = vpop.f32.mrb[1].mxu1 }
 0x161   : > { %v386_v16 = vadd.f32 %v583_v9, %v385_v14  ;;  %v418_v17 = vadd.f32 %v583_v9, %v417_v15  ;;  %v635_v18 = vpop.f32.mrb[2].mxu0  ;;  %v643_v19 = vpop.f32.mrb[2].mxu1 }
 0x162   : > { %450 = vst [vmem:[%s1132_s7 + $0x10] sm:$0xff] %v394_v12  ;;  %458 = vst [vmem:[%s1132_s7 + $0x50] sm:$0xff] %v426_v13  ;;  %v397_v20 = vadd.f32 %v635_v18, %v583_v9  ;;  %v429_v21 = vadd.f32 %v643_v19, %v583_v9  ;;  %v388_v22 = vpop.f32.mrb[3].mxu0  ;;  %v420_v23 = vpop.f32.mrb[3].mxu1 }
 0x163   : > { %448 = vst [vmem:[%s1132_s7] sm:$0xff] %v386_v16  ;;  %456 = vst [vmem:[%s1132_s7 + $0x40] sm:$0xff] %v418_v17  ;;  %v389_v24 = vadd.f32 %v583_v9, %v388_v22  ;;  %v421_v25 = vadd.f32 %v583_v9, %v420_v23 }
 0x164   : > { %451 = vst [vmem:[%s1132_s7 + $0x18] sm:$0xff] %v397_v20  ;;  %459 = vst [vmem:[%s1132_s7 + $0x58] sm:$0xff] %v429_v21 }
 0x165   : > { %449 = vst [vmem:[%s1132_s7 + $0x8] sm:$0xff] %v389_v24  ;;  %457 = vst [vmem:[%s1132_s7 + $0x48] sm:$0xff] %v421_v25 }
 0x167   : > { %v638_v26 = vpop.f32.mrb[4].mxu0  ;;  %v646_v27 = vpop.f32.mrb[4].mxu1 }
 0x168   : > { %v410_v28 = vadd.f32 %v638_v26, %v583_v9  ;;  %v442_v29 = vadd.f32 %v646_v27, %v583_v9  ;;  %v401_v30 = vpop.f32.mrb[5].mxu0  ;;  %v433_v31 = vpop.f32.mrb[5].mxu1 }
 0x169   : > { %v402_v32 = vadd.f32 %v583_v9, %v401_v30  ;;  %v434_v33 = vadd.f32 %v583_v9, %v433_v31  ;;  %v639_v34 = vpop.f32.mrb[6].mxu0  ;;  %v647_v35 = vpop.f32.mrb[6].mxu1 }
 0x16a   : > { %454 = vst [vmem:[%s1132_s7 + $0x30] sm:$0xff] %v410_v28  ;;  %462 = vst [vmem:[%s1132_s7 + $0x70] sm:$0xff] %v442_v29  ;;  %v413_v36 = vadd.f32 %v639_v34, %v583_v9  ;;  %v445_v37 = vadd.f32 %v647_v35, %v583_v9  ;;  %v404_v38 = vpop.f32.mrb[7].mxu0  ;;  %v436_v39 = vpop.f32.mrb[7].mxu1 }
 0x16b   : > { %452 = vst [vmem:[%s1132_s7 + $0x20] sm:$0xff] %v402_v32  ;;  %460 = vst [vmem:[%s1132_s7 + $0x60] sm:$0xff] %v434_v33  ;;  %v405_v40 = vadd.f32 %v583_v9, %v404_v38  ;;  %v437_v41 = vadd.f32 %v583_v9, %v436_v39 }
 0x16c   : > { %455 = vst [vmem:[%s1132_s7 + $0x38] sm:$0xff] %v413_v36  ;;  %463 = vst [vmem:[%s1132_s7 + $0x78] sm:$0xff] %v445_v37 }
 0x16d   : > { %453 = vst [vmem:[%s1132_s7 + $0x28] sm:$0xff] %v405_v40  ;;  %461 = vst [vmem:[%s1132_s7 + $0x68] sm:$0xff] %v437_v41 }
 0x16e   : > { %845 = shalt.err (!%p842_p2)
}
 0x16f   : > { %s846_s6 = scalar_lea.hbm %s1149_s13, 2048  ;;  %s850_s23 = scalar_lea.hbm %s1206_s5, 4096 }
 0x170   : > { %p847_p13 = scmp.ne.s32.totalorder %s1149_s13, %s846_s6  ;;  %p851_p4 = scmp.lt.u32.totalorder %s1149_s13, %s1206_s5 }
 0x171   : > { %p852_p5 = scmp.lt.u32.totalorder %s850_s23, %s846_s6  ;;  %p854_p8 = scmp.lt.u32.totalorder %s846_s6, %s1149_s13 }
 0x172   : > { %p848_p6 = pnand %p847_p13, %p1220_p11 }
 0x173   : > { %p853_p0 = por %p852_p5, %p851_p4 }
 0x174   : > { %p849_p10 = pneg %p848_p6 }
 0x175   : > { %p855_p1 = por %p854_p8, %p853_p0 }
 0x177   : > { %p856_p3 = pnand %p855_p1, %p849_p10 }
 0x179   : > { %859 = shalt.err (!%p856_p3)
}
 0x17a   : > { %s913_s7 = smov 128   ;;  %s914_s8 = smov 8  }
 0x17b   : > { %674 = dma.vmem_to_hbm [thread:$0]  (%p1220_p11), %s1151_s9, 2048, %s1149_s13, %s465_s26, %s913_s7, %s913_s7, %s914_s8  }
 0x17c PF: > { %s493_s21 = sand.u32 1, %s890_s18   ;;  %p1221_p7 = scmp.ne.s32.totalorder %s1211_s24, 0 }
 0x17d   : > { %p1222_p9 = scmp.ge.s32.totalorder %s902_s2, 2  ;;  %s494_s28 = scalar_lea.sflag [#allocation4], %s493_s21 }
 0x17f   : > { %p688_p12 = pnand %p1222_p9, %p1221_p7 }
 0x181   : > { %885 = dma.done.wait (!%p688_p12), %s494_s28, 2048  }
 0x182   : > { %887 = vsyncadd (!%p688_p12), %s494_s28, 4294965248  ;;  %p19_p2 = scmp.ge.s32.totalorder %s1055_s12, 4   ;;  %s1223_s18 = smov %s894_s19 }
 0x183   : > { %s1224_s19 = smov %s898_s20  ;;  %s1225_s20 = smov %s1071_s17 }
 0x184   : > { %s1226_s2 = smov %s1055_s12  ;;  %21 = sbr.rel (!%p19_p2) target bundleno = 6 (0x6), region = 93 }
 0x18b   :  { %499 = vsyncpa [#allocation3], 1 }
 0x18c   :  { %501 = vsyncpa [#allocation3 + $0x1], 1 }
 0x18d   :  { %502 = vsyncpa [#allocation6], 1 }
 0x18e   :  { %503 = vsyncpa [#allocation4], 1 }
 0x18f   :  { %505 = vsyncpa [#allocation4 + $0x1], 1 }

</bundles_post_ra>
